<compile_context>
chip_gen: v7x
topology: tpu7x:2x2x1
jax: 0.10.0
libtpu: 0.0.40
codegen_flags: <defaults>
</compile_context>

<pallas_src>
import functools

import jax
import jax.numpy as jnp
from jax.experimental import pallas as pl
from jax.experimental.pallas import tpu as pltpu


def _round_up(x, m):
    return (x + m - 1) // m * m


def _im2col_matmul_bias_relu_kernel(p_ref, w_ref, b_ref, o_ref):
    """One (row-tile, Cout-tile) block per grid step.

    p_ref : (TM, K)   im2col patches (K = 9*Cin), compute dtype
    w_ref : (K, TN)   BN-folded conv weights, compute dtype
    b_ref : (1, TN)   folded bias (conv bias + BN shift), f32
    o_ref : (TM, TN)  f32 output tile (lane-dense: TN % 128 == 0)
    """
    acc = jnp.dot(p_ref[...], w_ref[...], preferred_element_type=jnp.float32)
    o_ref[...] = jnp.maximum(acc + b_ref[...], 0.0).astype(o_ref.dtype)


@functools.partial(jax.jit, static_argnames=("BN", "compute_dtype"))
def block_forward(x_nchw, weight, conv_bias, gamma, beta,
                  running_mean, running_var, BN=True, eps=1e-5,
                  compute_dtype=jnp.bfloat16):
    """Conv2d(3x3, pad=1) + BatchNorm2d(eval) + ReLU.  x_nchw: (N, Cin, H, W)."""
    N, Cin, H, W = x_nchw.shape
    Cout = weight.shape[0]
    K = 9 * Cin
    M = N * H * W

    # ---- glue (plain JAX, runs once in XLA) --------------------------------
    # im2col: SAME-padded 3x3 patches, emitted directly channels-last, already
    # in the compute dtype (im2col only copies values -> exact in bf16).
    # Patch-feature ordering is channel-major: index = c*9 + dy*3 + dx.
    patches = jax.lax.conv_general_dilated_patches(
        x_nchw.astype(compute_dtype), filter_shape=(3, 3),
        window_strides=(1, 1), padding="SAME",
        dimension_numbers=("NCHW", "OIHW", "NHWC"))      # (N, H, W, Cin*9)
    patches = patches.reshape(M, K)

    # Fold conv bias + BN into (scale, shift); fold the scale into the weights.
    if BN:
        scale = gamma / jnp.sqrt(running_var + eps)
        bias = beta + (conv_bias - running_mean) * scale
    else:
        scale = jnp.ones((Cout,), jnp.float32)
        bias = conv_bias.astype(jnp.float32)
    # weight (Cout, Cin, 3, 3) -> (K, Cout); flattening gives c*9 + dy*3 + dx,
    # matching the patches feature ordering above.
    w2d = weight.reshape(Cout, K).T.astype(jnp.float32) * scale[None, :]

    # Lane-dense channel padding: Cout -> multiple of 128.
    Cout_p = _round_up(Cout, 128)
    TN = 256 if (Cout_p % 256 == 0) else 128
    w2d = jnp.pad(w2d, ((0, 0), (0, Cout_p - Cout))).astype(compute_dtype)
    bias_p = jnp.pad(bias.astype(jnp.float32),
                     (0, Cout_p - Cout)).reshape(1, Cout_p)

    # Row tiling (multiple of 8); biggest tile that comfortably fits VMEM
    # (tiles are double-buffered by the BlockSpec pipeline).
    if M >= 4096:
        TM = 1024
    elif M >= 1024:
        TM = 512
    elif M >= 256:
        TM = 256
    else:
        TM = _round_up(M, 8)
    itemsize = jnp.dtype(compute_dtype).itemsize
    while TM > 8 and 2 * ((TM * K + K * TN) * itemsize + TM * TN * 4) > (16 << 20):
        TM //= 2
    M_pad = _round_up(M, TM)
    patches = jnp.pad(patches, ((0, M_pad - M), (0, 0)))

    # ---- hot path: Pallas kernel -------------------------------------------
    out2d = pl.pallas_call(
        _im2col_matmul_bias_relu_kernel,
        out_shape=jax.ShapeDtypeStruct((M_pad, Cout_p), jnp.float32),
        grid_spec=pltpu.PrefetchScalarGridSpec(
            num_scalar_prefetch=0,
            grid=(M_pad // TM, Cout_p // TN),
            in_specs=[
                pl.BlockSpec((TM, K), lambda i, j: (i, 0)),
                pl.BlockSpec((K, TN), lambda i, j: (0, j)),
                pl.BlockSpec((1, TN), lambda i, j: (0, j)),
            ],
            out_specs=pl.BlockSpec((TM, TN), lambda i, j: (i, j)),
        ),
        compiler_params=pltpu.CompilerParams(
            dimension_semantics=("parallel", "parallel"),
            vmem_limit_bytes=32 * 1024 * 1024),
    )(patches, w2d, bias_p)

    # Slice off padding, back to PyTorch's NCHW convention.
    out_nhwc = out2d[:M, :Cout].reshape(N, H, W, Cout)
    return jnp.transpose(out_nhwc, (0, 3, 1, 2))


def _reference(x_nchw, weight, conv_bias, gamma, beta,
               running_mean, running_var, BN=True, eps=1e-5):
    """Pure-JAX reference (lax conv) for a correctness check."""
    y = jax.lax.conv_general_dilated(
        x_nchw.astype(jnp.float32), weight.astype(jnp.float32),
        window_strides=(1, 1), padding="SAME",
        dimension_numbers=("NCHW", "OIHW", "NCHW"))
    y = y + conv_bias[None, :, None, None]
    if BN:
        inv = gamma / jnp.sqrt(running_var + eps)
        y = (y - running_mean[None, :, None, None]) * inv[None, :, None, None]
        y = y + beta[None, :, None, None]
    return jnp.maximum(y, 0.0)


if __name__ == "__main__":
    # small shapes consistent with the module's constructor
    N, Cin, Cout, H, W = 2, 4, 8, 16, 16

    key = jax.random.PRNGKey(0)
    k_x, k_w, k_b, k_g, k_bt, k_m, k_v = jax.random.split(key, 7)

    x = jax.random.normal(k_x, (N, Cin, H, W), jnp.float32)

    # deterministic parameter init (synthetic, not a checkpoint load)
    weight = jax.random.normal(k_w, (Cout, Cin, 3, 3), jnp.float32) * 0.1
    conv_bias = jax.random.normal(k_b, (Cout,), jnp.float32) * 0.01
    gamma = 1.0 + 0.1 * jax.random.normal(k_g, (Cout,), jnp.float32)
    beta = 0.1 * jax.random.normal(k_bt, (Cout,), jnp.float32)
    running_mean = 0.1 * jax.random.normal(k_m, (Cout,), jnp.float32)
    running_var = 1.0 + 0.1 * jax.random.uniform(k_v, (Cout,), jnp.float32)

    ref = _reference(x, weight, conv_bias, gamma, beta,
                     running_mean, running_var, BN=True)

    # f32 compute path: tight check of kernel structure / im2col / BN folding.
    out_f32 = jax.block_until_ready(
        block_forward(x, weight, conv_bias, gamma, beta,
                      running_mean, running_var, BN=True,
                      compute_dtype=jnp.float32))
    assert out_f32.shape == (N, Cout, H, W)
    assert jnp.allclose(out_f32, ref, atol=1e-4, rtol=1e-4)

    # bf16 compute path (default perf config): bf16 MXU inputs + bf16 patches,
    # f32 accumulation + f32 epilogue -> looser tolerance.
    out_bf16 = jax.block_until_ready(
        block_forward(x, weight, conv_bias, gamma, beta,
                      running_mean, running_var, BN=True))
    assert out_bf16.shape == (N, Cout, H, W)
    assert jnp.allclose(out_bf16, ref, atol=5e-2, rtol=5e-2)

    print("KERNEL_OK")
</pallas_src>

<mosaic_0001>
module attributes {stable_mosaic.version = 11 : i64} {
  func.func @_im2col_matmul_bias_relu_kernel(%arg0: i32, %arg1: i32, %arg2: memref<256x36xf32, #tpu.memory_space<vmem>>, %arg3: memref<36x128xf32, #tpu.memory_space<vmem>>, %arg4: memref<1x128xf32, #tpu.memory_space<vmem>>, %arg5: memref<256x128xf32, #tpu.memory_space<vmem>>) attributes {dimension_semantics = [#tpu.dimension_semantics<parallel>, #tpu.dimension_semantics<parallel>], iteration_bounds = array<i64: 2, 1>, scalar_prefetch = 0 : i64, scratch_operands = 0 : i64, tpu.core_type = #tpu.core_type<tc>, window_params = [{transform_indices = @transform_0, window_bounds = array<i64: 256, 36>}, {transform_indices = @transform_1, window_bounds = array<i64: 36, 128>}, {transform_indices = @transform_2, window_bounds = array<i64: 1, 128>}, {transform_indices = @transform_3, window_bounds = array<i64: 256, 128>}]} {
    %c0 = arith.constant 0 : index
    %c0_0 = arith.constant 0 : index
    %0 = vector.load %arg2[%c0, %c0_0] : memref<256x36xf32, #tpu.memory_space<vmem>>, vector<256x36xf32>
    %c0_1 = arith.constant 0 : index
    %c0_2 = arith.constant 0 : index
    %1 = vector.load %arg3[%c0_1, %c0_2] : memref<36x128xf32, #tpu.memory_space<vmem>>, vector<36x128xf32>
    %cst = arith.constant dense<0.000000e+00> : vector<256x128xf32>
    %2 = tpu.matmul %0, %1, %cst {dimension_numbers = #tpu.dot_dimension_numbers<[1], [0], [0], [1], [0, 0, 1, 1], [], []>} : vector<256x36xf32>, vector<36x128xf32>, vector<256x128xf32> -> vector<256x128xf32>
    %c0_3 = arith.constant 0 : index
    %c0_4 = arith.constant 0 : index
    %3 = vector.load %arg4[%c0_3, %c0_4] : memref<1x128xf32, #tpu.memory_space<vmem>>, vector<1x128xf32>
    %4 = vector.broadcast %3 : vector<1x128xf32> to vector<256x128xf32>
    %5 = arith.addf %2, %4 : vector<256x128xf32>
    %cst_5 = arith.constant 0.000000e+00 : f32
    %6 = vector.broadcast %cst_5 : f32 to vector<256x128xf32>
    %7 = arith.maximumf %5, %6 : vector<256x128xf32>
    %c0_6 = arith.constant 0 : index
    %c0_7 = arith.constant 0 : index
    %8 = vector.load %arg5[%c0_6, %c0_7] : memref<256x128xf32, #tpu.memory_space<vmem>>, vector<256x128xf32>
    tpu.vector_store %arg5[%c0_6, %c0_7], %7 {strides = array<i32>} : memref<256x128xf32, #tpu.memory_space<vmem>>, vector<256x128xf32>,
    return
  }
  func.func @transform_0(%arg0: i32, %arg1: i32) -> (i32, i32) {
    %c0_i32 = arith.constant 0 : i32
    %c0_i32_0 = arith.constant 0 : i32
    return %arg0, %c0_i32 : i32, i32
  }
  func.func @transform_1(%arg0: i32, %arg1: i32) -> (i32, i32) {
    %c0_i32 = arith.constant 0 : i32
    %c0_i32_0 = arith.constant 0 : i32
    return %c0_i32, %arg1 : i32, i32
  }
  func.func @transform_2(%arg0: i32, %arg1: i32) -> (i32, i32) {
    %c0_i32 = arith.constant 0 : i32
    %c0_i32_0 = arith.constant 0 : i32
    return %c0_i32, %arg1 : i32, i32
  }
  func.func @transform_3(%arg0: i32, %arg1: i32) -> (i32, i32) {
    %c0_i32 = arith.constant 0 : i32
    return %arg0, %arg1 : i32, i32
  }
}

</mosaic_0001>

<bundles_post_ra>
// kernel: block_forward.1
= control target key start
LH: loop header
LB: loop body
LE: loop exit
PB: predicated region body
PF: predicated region fallthrough
CT: control target
= control target key end

     0   :  { %s985_s12 = smov 0   ;;  %s987_s13 = smov 0   ;;  %s1181_s0 = inlined_call_operand.vmem [shape: f32[512,36], index: 0, kind: input, shape index: {}]   ;;  %s1182_s1 = inlined_call_operand.vmem [shape: f32[36,128], index: 1, kind: input, shape index: {}]   ;;  %s1183_s2 = inlined_call_operand.vmem [shape: f32[1,128], index: 2, kind: input, shape index: {}]   ;;  %s1184_s3 = inlined_call_operand.vmem [shape: f32[512,128], index: 3, kind: output, shape index: {}]  }
   0x1   :  { %s989_s14 = smov 0  }
   0x2 LB: > { %s25_s15 = sadd.s32 1, %s959_s13  ;;  %p767_p0 = scmp.ge.s32.totalorder %s963_s14, 1  ;;  %s963_s14 = sphi %s989_s14, %s13_s14   ;;  %s959_s13 = sphi %s987_s13, %s1186_s13   ;;  %s955_s12 = sphi %s985_s12, %s1185_s12  }
   0x3   : > { %p27_p1 = scmp.ge.s32.totalorder %s25_s15, 2  ;;  %p169_p2 = scmp.lt.s32.totalorder %s963_s14, 3 }
   0x5   : > { %s1188_s15 = smov (%p27_p1, %s25_s15), 0  ;;  %p170_p3 = pnand %p767_p0, %p169_p2 }
   0x6   : > { %v257_v0 = vld [vmem:[%s1182_s1] sm:$0xff] (!%p170_p3)  ;;  %v258_v1 = vld [vmem:[%s1182_s1 + $0x8] sm:$0xff] (!%p170_p3)  ;;  %v259_v2 = vld [vmem:[%s1182_s1 + $0x10] sm:$0xff] (!%p170_p3)  ;;  %s768_s22 = sshll.u32 (!%p170_p3), %s955_s12, 5  ;;  %vm366_vm0 = vcmask (!%p170_p3), 1043456   ;;  %vm269_vm1 = vcmask (!%p170_p3), 293888  }
   0x7   : > { %173 = sbr.rel (%p170_p3) target bundleno = 266 (0x10a), region = 32  ;;  %v903_v3 = vpack.c.bf16 (!%p170_p3), %v258_v1, %v257_v0  ;;  %v260_v4 = vld [vmem:[%s1182_s1 + $0x18] sm:$0xff] (!%p170_p3)  ;;  %p204_p4 = scmp.lt.s32.totalorder (!%p170_p3), %s768_s22, 63  ;;  %v261_v6 = vld [vmem:[%s1182_s1 + $0x20] sm:$0xf] (!%p170_p3) }
   0x8   : > { %v907_v5 = vpack.c.bf16 (!%p170_p3), %v260_v4, %v259_v2  ;;  %v1099_v39 = vld [vmem:[%s1183_s2] ss:$0 sm:$0xff] (!%p170_p3) }
   0x9   : > { %904 = vmatprep.subr.bf16.mxu0 (!%p170_p3), %v903_v3  ;;  %911 = vmatprep.subr.bf16.mxu1 (!%p170_p3), %v903_v3 }
   0xa   : > { %906 = vmatpush3.bf16.msra.mxu0 (!%p170_p3), %v903_v3  ;;  %914 = vmatpush3.bf16.msra.mxu1 (!%p170_p3), %v903_v3 }
   0xb   : > { %908 = vmatprep.subr.bf16.mxu0 (!%p170_p3), %v907_v5  ;;  %912 = vmatprep.subr.bf16.mxu1 (!%p170_p3), %v907_v5 }
   0xe   : > { %s1190_s22 = smov (!%p204_p4, %s768_s22), 63  ;;  %910 = vmatpush3.bf16.msra.mxu0 %v907_v5  ;;  %915 = vmatpush3.bf16.msra.mxu1 %v907_v5 }
   0xf   : > { %s769_s25 = sshll.u32 %s1190_s22, 3  ;;  %853 = vmatprep.subr.msk.mxu0 %vm366_vm0, %v261_v6  ;;  %913 = vmatprep.subr.msk.mxu1 %vm366_vm0, %v261_v6 }
  0x10   : > { %s1026_s30 = scalar_lea.vmem %s1181_s0, %s769_s25  ;;  %s1108_s8 = scalar_lea.vmem %s1184_s3, %s769_s25 }
  0x11   : > { %v225_v7 = vld [vmem:[%s1026_s30] sm:$0xff]  ;;  %v226_v9 = vld [vmem:[%s1026_s30 + $0x8] sm:$0xff]  ;;  %v227_v11 = vld [vmem:[%s1026_s30 + $0x10] sm:$0xff] }
  0x12   : > { %v241_v8 = vld [vmem:[%s1026_s30 + $0x80] sm:$0xff]  ;;  %855 = vmatprep.mubr.msk.f32.mxu0 %vm269_vm1, %v225_v7  ;;  %v242_v10 = vld [vmem:[%s1026_s30 + $0x88] sm:$0xff]  ;;  %v243_v12 = vld [vmem:[%s1026_s30 + $0x90] sm:$0xff]  ;;  %854 = vmatpush3.msk.msra.mxu0 %vm366_vm0, %v261_v6 }
  0x13   : > { %879 = vmatprep.mubr.msk.f32.mxu1 %vm269_vm1, %v241_v8  ;;  %916 = vmatpush3.msk.msra.mxu1 %vm366_vm0, %v261_v6  ;;  %v228_v13 = vld [vmem:[%s1026_s30 + $0x18] sm:$0xff]  ;;  %v229_v15 = vld [vmem:[%s1026_s30 + $0x20] sm:$0xff]  ;;  %v230_v17 = vld [vmem:[%s1026_s30 + $0x28] sm:$0xff] }
  0x14   : > { %856 = vmatmul.mubr.msk.f32.vlgmr.msra.gmra.mrb[0].mxu0 %vm269_vm1, %v226_v9  ;;  %880 = vmatmul.mubr.msk.f32.vlgmr.msra.gmra.mrb[0].mxu1 %vm269_vm1, %v242_v10  ;;  %v244_v14 = vld [vmem:[%s1026_s30 + $0x98] sm:$0xff]  ;;  %v245_v16 = vld [vmem:[%s1026_s30 + $0xa0] sm:$0xff]  ;;  %v246_v18 = vld [vmem:[%s1026_s30 + $0xa8] sm:$0xff] }
  0x15   : > { %858 = vmatprep.mubr.msk.f32.mxu0 %vm269_vm1, %v227_v11  ;;  %882 = vmatprep.mubr.msk.f32.mxu1 %vm269_vm1, %v243_v12  ;;  %v231_v19 = vld [vmem:[%s1026_s30 + $0x30] sm:$0xff]  ;;  %v232_v21 = vld [vmem:[%s1026_s30 + $0x38] sm:$0xff]  ;;  %v233_v23 = vld [vmem:[%s1026_s30 + $0x40] sm:$0xff] }
  0x16   : > { %v247_v20 = vld [vmem:[%s1026_s30 + $0xb0] sm:$0xff]  ;;  %v248_v22 = vld [vmem:[%s1026_s30 + $0xb8] sm:$0xff]  ;;  %v249_v24 = vld [vmem:[%s1026_s30 + $0xc0] sm:$0xff] }
  0x17   : > { %v234_v25 = vld [vmem:[%s1026_s30 + $0x48] sm:$0xff]  ;;  %v235_v27 = vld [vmem:[%s1026_s30 + $0x50] sm:$0xff]  ;;  %v236_v29 = vld [vmem:[%s1026_s30 + $0x58] sm:$0xff] }
  0x18   : > { %859 = vmatmul.mubr.msk.f32.gmra.mrb[2].mxu0 %vm269_vm1, %v228_v13  ;;  %883 = vmatmul.mubr.msk.f32.gmra.mrb[2].mxu1 %vm269_vm1, %v244_v14  ;;  %v250_v26 = vld [vmem:[%s1026_s30 + $0xc8] sm:$0xff]  ;;  %v251_v28 = vld [vmem:[%s1026_s30 + $0xd0] sm:$0xff]  ;;  %v252_v30 = vld [vmem:[%s1026_s30 + $0xd8] sm:$0xff] }
  0x19   : > { %861 = vmatprep.mubr.msk.f32.mxu0 %vm269_vm1, %v229_v15  ;;  %885 = vmatprep.mubr.msk.f32.mxu1 %vm269_vm1, %v245_v16  ;;  %v237_v31 = vld [vmem:[%s1026_s30 + $0x60] sm:$0xff]  ;;  %v238_v33 = vld [vmem:[%s1026_s30 + $0x68] sm:$0xff]  ;;  %v239_v35 = vld [vmem:[%s1026_s30 + $0x70] sm:$0xff] }
  0x1a   : > { %v253_v32 = vld [vmem:[%s1026_s30 + $0xe0] sm:$0xff]  ;;  %v254_v34 = vld [vmem:[%s1026_s30 + $0xe8] sm:$0xff]  ;;  %v255_v36 = vld [vmem:[%s1026_s30 + $0xf0] sm:$0xff] }
  0x1b   : > { %v240_v37 = vld [vmem:[%s1026_s30 + $0x78] sm:$0xff] }
  0x1c   : > { %862 = vmatmul.mubr.msk.f32.gmra.mrb[4].mxu0 %vm269_vm1, %v230_v17  ;;  %886 = vmatmul.mubr.msk.f32.gmra.mrb[4].mxu1 %vm269_vm1, %v246_v18  ;;  %v256_v38 = vld [vmem:[%s1026_s30 + $0xf8] sm:$0xff] }
  0x1d   : > { %864 = vmatprep.mubr.msk.f32.mxu0 %vm269_vm1, %v231_v19  ;;  %888 = vmatprep.mubr.msk.f32.mxu1 %vm269_vm1, %v247_v20 }
  0x20   : > { %865 = vmatmul.mubr.msk.f32.gmra.mrb[6].mxu0 %vm269_vm1, %v232_v21  ;;  %889 = vmatmul.mubr.msk.f32.gmra.mrb[6].mxu1 %vm269_vm1, %v248_v22 }
  0x21   : > { %867 = vmatprep.mubr.msk.f32.mxu0 %vm269_vm1, %v233_v23  ;;  %891 = vmatprep.mubr.msk.f32.mxu1 %vm269_vm1, %v249_v24 }
  0x24   : > { %868 = vmatmul.mubr.msk.f32.gmra.mrb[8].mxu0 %vm269_vm1, %v234_v25  ;;  %892 = vmatmul.mubr.msk.f32.gmra.mrb[8].mxu1 %vm269_vm1, %v250_v26 }
  0x25   : > { %870 = vmatprep.mubr.msk.f32.mxu0 %vm269_vm1, %v235_v27  ;;  %894 = vmatprep.mubr.msk.f32.mxu1 %vm269_vm1, %v251_v28 }
  0x28   : > { %871 = vmatmul.mubr.msk.f32.gmra.mrb[10].mxu0 %vm269_vm1, %v236_v29  ;;  %895 = vmatmul.mubr.msk.f32.gmra.mrb[10].mxu1 %vm269_vm1, %v252_v30 }
  0x29   : > { %873 = vmatprep.mubr.msk.f32.mxu0 %vm269_vm1, %v237_v31  ;;  %897 = vmatprep.mubr.msk.f32.mxu1 %vm269_vm1, %v253_v32 }
  0x2c   : > { %874 = vmatmul.mubr.msk.f32.gmra.mrb[12].mxu0 %vm269_vm1, %v238_v33  ;;  %898 = vmatmul.mubr.msk.f32.gmra.mrb[12].mxu1 %vm269_vm1, %v254_v34 }
  0x2d   : > { %876 = vmatprep.mubr.msk.f32.mxu0 %vm269_vm1, %v239_v35  ;;  %900 = vmatprep.mubr.msk.f32.mxu1 %vm269_vm1, %v255_v36 }
  0x30   : > { %877 = vmatmul.mubr.msk.f32.gmra.mrb[14].mxu0 %vm269_vm1, %v240_v37  ;;  %901 = vmatmul.mubr.msk.f32.gmra.mrb[14].mxu1 %vm269_vm1, %v256_v38 }
  0xe7   : > { %v857_v40 = vpop.f32.mrb[0].mxu0  ;;  %v881_v41 = vpop.f32.mrb[0].mxu1 }
  0xe8   : > { %v442_v42 = vadd.f32 %v857_v40, %v1099_v39  ;;  %v522_v43 = vadd.f32 %v881_v41, %v1099_v39  ;;  %v436_v44 = vpop.f32.mrb[1].mxu0  ;;  %v516_v45 = vpop.f32.mrb[1].mxu1 }
  0xe9   : > { %v437_v46 = vadd.f32 %v1099_v39, %v436_v44  ;;  %v517_v47 = vadd.f32 %v1099_v39, %v516_v45 }
  0xea   : > { %v596_v48 = vmax.f32 %v442_v42, 0.0  ;;  %v612_v49 = vmax.f32 %v522_v43, 0.0 }
  0xeb   : > { %v595_v50 = vmax.f32 %v437_v46, 0.0  ;;  %v611_v51 = vmax.f32 %v517_v47, 0.0  ;;  %v860_v52 = vpop.f32.mrb[2].mxu0  ;;  %v884_v53 = vpop.f32.mrb[2].mxu1 }
  0xec   : > { %628 = vst [vmem:[%s1108_s8 + $0x8] sm:$0xff] %v596_v48  ;;  %644 = vst [vmem:[%s1108_s8 + $0x88] sm:$0xff] %v612_v49  ;;  %v452_v54 = vadd.f32 %v860_v52, %v1099_v39  ;;  %v532_v55 = vadd.f32 %v884_v53, %v1099_v39  ;;  %v446_v56 = vpop.f32.mrb[3].mxu0  ;;  %v526_v57 = vpop.f32.mrb[3].mxu1 }
  0xed   : > { %627 = vst [vmem:[%s1108_s8] sm:$0xff] %v595_v50  ;;  %643 = vst [vmem:[%s1108_s8 + $0x80] sm:$0xff] %v611_v51  ;;  %v447_v58 = vadd.f32 %v1099_v39, %v446_v56  ;;  %v527_v59 = vadd.f32 %v1099_v39, %v526_v57 }
  0xee   : > { %v598_v60 = vmax.f32 %v452_v54, 0.0  ;;  %v614_v61 = vmax.f32 %v532_v55, 0.0 }
  0xef   : > { %v597_v62 = vmax.f32 %v447_v58, 0.0  ;;  %v613_v63 = vmax.f32 %v527_v59, 0.0  ;;  %v863_v0 = vpop.f32.mrb[4].mxu0  ;;  %v887_v1 = vpop.f32.mrb[4].mxu1 }
  0xf0   : > { %630 = vst [vmem:[%s1108_s8 + $0x18] sm:$0xff] %v598_v60  ;;  %646 = vst [vmem:[%s1108_s8 + $0x98] sm:$0xff] %v614_v61  ;;  %v462_v2 = vadd.f32 %v863_v0, %v1099_v39  ;;  %v542_v3 = vadd.f32 %v887_v1, %v1099_v39  ;;  %v456_v4 = vpop.f32.mrb[5].mxu0  ;;  %v536_v5 = vpop.f32.mrb[5].mxu1 }
  0xf1   : > { %629 = vst [vmem:[%s1108_s8 + $0x10] sm:$0xff] %v597_v62  ;;  %645 = vst [vmem:[%s1108_s8 + $0x90] sm:$0xff] %v613_v63  ;;  %v457_v6 = vadd.f32 %v1099_v39, %v456_v4  ;;  %v537_v7 = vadd.f32 %v1099_v39, %v536_v5 }
  0xf2   : > { %v600_v8 = vmax.f32 %v462_v2, 0.0  ;;  %v616_v9 = vmax.f32 %v542_v3, 0.0 }
  0xf3   : > { %v599_v10 = vmax.f32 %v457_v6, 0.0  ;;  %v615_v11 = vmax.f32 %v537_v7, 0.0  ;;  %v866_v12 = vpop.f32.mrb[6].mxu0  ;;  %v890_v13 = vpop.f32.mrb[6].mxu1 }
  0xf4   : > { %632 = vst [vmem:[%s1108_s8 + $0x28] sm:$0xff] %v600_v8  ;;  %648 = vst [vmem:[%s1108_s8 + $0xa8] sm:$0xff] %v616_v9  ;;  %v472_v14 = vadd.f32 %v866_v12, %v1099_v39  ;;  %v552_v15 = vadd.f32 %v890_v13, %v1099_v39  ;;  %v466_v16 = vpop.f32.mrb[7].mxu0  ;;  %v546_v17 = vpop.f32.mrb[7].mxu1 }
  0xf5   : > { %631 = vst [vmem:[%s1108_s8 + $0x20] sm:$0xff] %v599_v10  ;;  %647 = vst [vmem:[%s1108_s8 + $0xa0] sm:$0xff] %v615_v11  ;;  %v467_v18 = vadd.f32 %v1099_v39, %v466_v16  ;;  %v547_v19 = vadd.f32 %v1099_v39, %v546_v17 }
  0xf6   : > { %v602_v20 = vmax.f32 %v472_v14, 0.0  ;;  %v618_v21 = vmax.f32 %v552_v15, 0.0 }
  0xf7   : > { %v601_v22 = vmax.f32 %v467_v18, 0.0  ;;  %v617_v23 = vmax.f32 %v547_v19, 0.0  ;;  %v869_v24 = vpop.f32.mrb[8].mxu0  ;;  %v893_v25 = vpop.f32.mrb[8].mxu1 }
  0xf8   : > { %634 = vst [vmem:[%s1108_s8 + $0x38] sm:$0xff] %v602_v20  ;;  %650 = vst [vmem:[%s1108_s8 + $0xb8] sm:$0xff] %v618_v21  ;;  %v482_v26 = vadd.f32 %v869_v24, %v1099_v39  ;;  %v562_v27 = vadd.f32 %v893_v25, %v1099_v39  ;;  %v476_v28 = vpop.f32.mrb[9].mxu0  ;;  %v556_v29 = vpop.f32.mrb[9].mxu1 }
  0xf9   : > { %633 = vst [vmem:[%s1108_s8 + $0x30] sm:$0xff] %v601_v22  ;;  %649 = vst [vmem:[%s1108_s8 + $0xb0] sm:$0xff] %v617_v23  ;;  %v477_v30 = vadd.f32 %v1099_v39, %v476_v28  ;;  %v557_v31 = vadd.f32 %v1099_v39, %v556_v29 }
  0xfa   : > { %v604_v32 = vmax.f32 %v482_v26, 0.0  ;;  %v620_v33 = vmax.f32 %v562_v27, 0.0 }
  0xfb   : > { %v603_v34 = vmax.f32 %v477_v30, 0.0  ;;  %v619_v35 = vmax.f32 %v557_v31, 0.0  ;;  %v872_v36 = vpop.f32.mrb[10].mxu0  ;;  %v896_v37 = vpop.f32.mrb[10].mxu1 }
  0xfc   : > { %636 = vst [vmem:[%s1108_s8 + $0x48] sm:$0xff] %v604_v32  ;;  %652 = vst [vmem:[%s1108_s8 + $0xc8] sm:$0xff] %v620_v33  ;;  %v492_v38 = vadd.f32 %v872_v36, %v1099_v39  ;;  %v572_v40 = vadd.f32 %v896_v37, %v1099_v39  ;;  %v486_v41 = vpop.f32.mrb[11].mxu0  ;;  %v566_v42 = vpop.f32.mrb[11].mxu1 }
  0xfd   : > { %635 = vst [vmem:[%s1108_s8 + $0x40] sm:$0xff] %v603_v34  ;;  %651 = vst [vmem:[%s1108_s8 + $0xc0] sm:$0xff] %v619_v35  ;;  %v487_v43 = vadd.f32 %v1099_v39, %v486_v41  ;;  %v567_v44 = vadd.f32 %v1099_v39, %v566_v42 }
  0xfe   : > { %v606_v45 = vmax.f32 %v492_v38, 0.0  ;;  %v622_v46 = vmax.f32 %v572_v40, 0.0 }
  0xff   : > { %v605_v47 = vmax.f32 %v487_v43, 0.0  ;;  %v621_v48 = vmax.f32 %v567_v44, 0.0  ;;  %v875_v49 = vpop.f32.mrb[12].mxu0  ;;  %v899_v50 = vpop.f32.mrb[12].mxu1 }
 0x100   : > { %638 = vst [vmem:[%s1108_s8 + $0x58] sm:$0xff] %v606_v45  ;;  %654 = vst [vmem:[%s1108_s8 + $0xd8] sm:$0xff] %v622_v46  ;;  %v502_v51 = vadd.f32 %v875_v49, %v1099_v39  ;;  %v582_v52 = vadd.f32 %v899_v50, %v1099_v39  ;;  %v496_v53 = vpop.f32.mrb[13].mxu0  ;;  %v576_v54 = vpop.f32.mrb[13].mxu1 }
 0x101   : > { %637 = vst [vmem:[%s1108_s8 + $0x50] sm:$0xff] %v605_v47  ;;  %653 = vst [vmem:[%s1108_s8 + $0xd0] sm:$0xff] %v621_v48  ;;  %v497_v55 = vadd.f32 %v1099_v39, %v496_v53  ;;  %v577_v56 = vadd.f32 %v1099_v39, %v576_v54 }
 0x102   : > { %v608_v57 = vmax.f32 %v502_v51, 0.0  ;;  %v624_v58 = vmax.f32 %v582_v52, 0.0 }
 0x103   : > { %v607_v59 = vmax.f32 %v497_v55, 0.0  ;;  %v623_v60 = vmax.f32 %v577_v56, 0.0  ;;  %v878_v61 = vpop.f32.mrb[14].mxu0  ;;  %v902_v62 = vpop.f32.mrb[14].mxu1 }
 0x104   : > { %640 = vst [vmem:[%s1108_s8 + $0x68] sm:$0xff] %v608_v57  ;;  %656 = vst [vmem:[%s1108_s8 + $0xe8] sm:$0xff] %v624_v58  ;;  %v512_v63 = vadd.f32 %v878_v61, %v1099_v39  ;;  %v592_v0 = vadd.f32 %v902_v62, %v1099_v39  ;;  %v506_v1 = vpop.f32.mrb[15].mxu0  ;;  %v586_v2 = vpop.f32.mrb[15].mxu1 }
 0x105   : > { %639 = vst [vmem:[%s1108_s8 + $0x60] sm:$0xff] %v607_v59  ;;  %655 = vst [vmem:[%s1108_s8 + $0xe0] sm:$0xff] %v623_v60  ;;  %v507_v3 = vadd.f32 %v1099_v39, %v506_v1  ;;  %v587_v4 = vadd.f32 %v1099_v39, %v586_v2 }
 0x106   : > { %v610_v5 = vmax.f32 %v512_v63, 0.0  ;;  %v626_v6 = vmax.f32 %v592_v0, 0.0 }
 0x107   : > { %v609_v7 = vmax.f32 %v507_v3, 0.0  ;;  %v625_v8 = vmax.f32 %v587_v4, 0.0 }
 0x108   : > { %642 = vst [vmem:[%s1108_s8 + $0x78] sm:$0xff] %v610_v5  ;;  %658 = vst [vmem:[%s1108_s8 + $0xf8] sm:$0xff] %v626_v6 }
 0x109   : > { %641 = vst [vmem:[%s1108_s8 + $0x70] sm:$0xff] %v609_v7  ;;  %657 = vst [vmem:[%s1108_s8 + $0xf0] sm:$0xff] %v625_v8 }
 0x10a PF: > { %s13_s14 = sadd.s32 1, %s963_s14   ;;  %s1185_s12 = smov %s959_s13 }
 0x10b   : > { %p10_p5 = scmp.ge.s32.totalorder %s13_s14, 4   ;;  %s1186_s13 = smov %s1188_s15 }
 0x10d   :  { %12 = sbr.rel (!%p10_p5) target bundleno = 2 (0x2), region = 68 }

</bundles_post_ra>
